<compile_context>
chip_gen: v7x
topology: tpu7x:2x2x1
jax: 0.10.0
libtpu: 0.0.40
codegen_flags: <defaults>
</compile_context>

<pallas_src>
import functools
import math

import numpy as np
import jax
import jax.numpy as jnp
from jax.experimental import pallas as pl
from jax.experimental.pallas import tpu as pltpu


_VMEM_LIMIT_BYTES = 40 << 20      # explicit scoped-VMEM limit (fits v5e/v6e/v7x)
_RESIDENT_MAX_WIDTH = 512         # basis wider than this -> tiled N/K path
_PACK_MAX_WIDTH = 512             # largest lane-packed row width we build


# --------------------------------------------------------------------------- #
# Kernels
# --------------------------------------------------------------------------- #
def _dst_resident_kernel(x_ref, w_ref, o_ref):
    # Per-tile MXU matmul against the VMEM-resident basis; accumulate in f32.
    o_ref[...] = jnp.dot(
        x_ref[...], w_ref[...], preferred_element_type=jnp.float32
    ).astype(o_ref.dtype)


def _dst_tiled_kernel(x_ref, w_ref, o_ref, acc_ref):
    # K-tiled matmul with a resident f32 accumulator (large-L path).
    @pl.when(pl.program_id(2) == 0)
    def _():
        acc_ref[...] = jnp.zeros_like(acc_ref)

    acc_ref[...] += jnp.dot(
        x_ref[...], w_ref[...], preferred_element_type=jnp.float32
    )

    @pl.when(pl.program_id(2) == pl.num_programs(2) - 1)
    def _():
        o_ref[...] = acc_ref[...].astype(o_ref.dtype)


# --------------------------------------------------------------------------- #
# Tiling helpers
# --------------------------------------------------------------------------- #
def _choose_tm(M: int, lane_width: int, itemsize: int, *, target_bytes: int = 4 << 20) -> int:
    """Row-tile size: dtype-aware sublane multiple, ~target_bytes per tile,
    and at least 2 grid steps when there are enough rows (v7x megacore)."""
    sub = max(8, 32 // itemsize)                       # f32->8, bf16->16, i8/fp8->32
    lanes = ((max(lane_width, 1) + 127) // 128) * 128  # VMEM pads lane dim to >=128
    tm = max(sub, (target_bytes // (lanes * itemsize)) // sub * sub)
    if M > 2 * sub:
        half = (((M + 1) // 2) + sub - 1) // sub * sub  # ceil(M/2) rounded up to sub
        tm = min(tm, half)                              # guarantees grid_m >= 2
    if tm >= M:
        return M                                        # single full block
    return tm


# --------------------------------------------------------------------------- #
# Module
# --------------------------------------------------------------------------- #
class DiscreteSineTransform:
    """DST module: y = x @ W, W precomputed on host (mirrors diffsptk)."""

    def __init__(self, dst_length: int, dtype=jnp.float32):
        assert 1 <= dst_length
        L = int(dst_length)
        self.dst_length = L
        self.dtype = dtype

        W_np = self._precompute_np(L)                  # float64, host
        self.W = jnp.asarray(W_np, dtype=dtype)

        # ---- choose a lane-dense presentation of the basis, once, on host ----
        g = 128 // math.gcd(L, 128)
        self.pad_cols = 0
        self.pad_k = 0
        if g > 1 and g * L <= _PACK_MAX_WIDTH:
            # Lane-pack: fold g rows per packed row; block-diagonal basis.
            self.g = g
            Wk_np = np.kron(np.eye(g, dtype=np.float64), W_np)
        elif L % 128 == 0:
            self.g = 1
            Wk_np = W_np
        else:
            # Pad output (and for the tiled path also input) columns to 128n.
            Lp = ((L + 127) // 128) * 128
            self.g = 1
            self.pad_cols = Lp - L
            if Lp <= _RESIDENT_MAX_WIDTH:
                Wk_np = np.zeros((L, Lp), dtype=np.float64)
                Wk_np[:, :L] = W_np                    # pad N only (K = L stays)
            else:
                self.pad_k = Lp - L
                Wk_np = np.zeros((Lp, Lp), dtype=np.float64)
                Wk_np[:L, :L] = W_np                   # pad K and N (tiled path)
        self.Wk = jnp.asarray(Wk_np, dtype=dtype)

    # -- diffsptk DiscreteSineTransform._precompute, on host in float64 -------
    @staticmethod
    def _precompute_np(length: int) -> np.ndarray:
        L = length
        k = np.arange(L, dtype=np.float64) + 1.0       # k = 1..L
        n = np.pi / L * (k - 0.5)
        z = np.sqrt(np.clip(k, 1.0, 2.0) / L)[::-1]    # flip(0)
        return z[None, :] * np.sin(k[None, :] * n[:, None])

    # -------------------------------------------------------------------------
    def __call__(self, x: jnp.ndarray) -> jnp.ndarray:
        L = self.dst_length
        assert x.shape[-1] == L, "dimension of input must equal dst_length"

        lead = x.shape[:-1]
        M = int(np.prod(lead)) if lead else 1
        if M == 0:
            return jnp.matmul(x, self.W)

        itemsize = jnp.dtype(x.dtype).itemsize
        g = self.g
        x2d = x.reshape(M, L)

        # Square-padded basis (rare: L > 512, L % 128 != 0) -> pad K on input.
        if self.pad_k:
            x2d = jnp.pad(x2d, ((0, 0), (0, self.pad_k)))

        # Lane-packing: pad rows to a multiple of g, then free row-major reshape.
        Mp = M
        if g > 1:
            Mp = ((M + g - 1) // g) * g
            if Mp != M:
                x2d = jnp.pad(x2d, ((0, Mp - M), (0, 0)))
            x2d = x2d.reshape(Mp // g, g * L)

        Nk = self.Wk.shape[1]
        if Nk <= _RESIDENT_MAX_WIDTH:
            out2d = self._call_resident(x2d, itemsize)
        else:
            out2d = self._call_tiled(x2d, itemsize)

        if g > 1:
            out2d = out2d.reshape(Mp, L)
            if Mp != M:
                out2d = out2d[:M]
        elif self.pad_cols:
            out2d = out2d[:, :L]
        return out2d.reshape(*lead, L)

    # -- small basis: resident W, 1-D "parallel" grid over row tiles ----------
    def _call_resident(self, x2d, itemsize):
        Mk, Kk = x2d.shape
        Nk = self.Wk.shape[1]
        TM = _choose_tm(Mk, max(Kk, Nk), itemsize)
        grid_m = int(pl.cdiv(Mk, TM))

        cost = pl.CostEstimate(
            flops=int(2 * Mk * Kk * Nk),
            transcendentals=0,
            bytes_accessed=int((Mk * Kk + Mk * Nk + Kk * Nk) * itemsize),
        )
        return pl.pallas_call(
            _dst_resident_kernel,
            out_shape=jax.ShapeDtypeStruct((Mk, Nk), x2d.dtype),
            grid_spec=pltpu.PrefetchScalarGridSpec(
                num_scalar_prefetch=0,
                grid=(grid_m,),
                in_specs=[
                    pl.BlockSpec((TM, Kk), lambda i: (i, 0)),   # streamed row tiles
                    pl.BlockSpec((Kk, Nk), lambda i: (0, 0)),   # basis DMA'd once
                ],
                out_specs=pl.BlockSpec((TM, Nk), lambda i: (i, 0)),
            ),
            compiler_params=pltpu.CompilerParams(
                dimension_semantics=("parallel",),
                vmem_limit_bytes=_VMEM_LIMIT_BYTES,
            ),
            cost_estimate=cost,
        )(x2d, self.Wk)

    # -- large basis: 3-D grid, K-accumulation in VMEM scratch ----------------
    def _call_tiled(self, x2d, itemsize):
        Mk, Kk = x2d.shape
        Nk = self.Wk.shape[1]
        TN = 256 if Nk % 256 == 0 else 128
        TK = 256 if Kk % 256 == 0 else 128
        TM = min(_choose_tm(Mk, TK, itemsize, target_bytes=1 << 20), 256)
        grid = (int(pl.cdiv(Mk, TM)), Nk // TN, Kk // TK)

        cost = pl.CostEstimate(
            flops=int(2 * Mk * Kk * Nk),
            transcendentals=0,
            bytes_accessed=int((Mk * Kk + Mk * Nk + Kk * Nk) * itemsize),
        )
        return pl.pallas_call(
            _dst_tiled_kernel,
            out_shape=jax.ShapeDtypeStruct((Mk, Nk), x2d.dtype),
            grid_spec=pltpu.PrefetchScalarGridSpec(
                num_scalar_prefetch=0,
                grid=grid,
                in_specs=[
                    pl.BlockSpec((TM, TK), lambda i, j, k: (i, k)),
                    pl.BlockSpec((TK, TN), lambda i, j, k: (k, j)),
                ],
                out_specs=pl.BlockSpec((TM, TN), lambda i, j, k: (i, j)),
                scratch_shapes=[pltpu.VMEM((TM, TN), jnp.float32)],
            ),
            compiler_params=pltpu.CompilerParams(
                dimension_semantics=("parallel", "parallel", "arbitrary"),
                vmem_limit_bytes=_VMEM_LIMIT_BYTES,
            ),
            cost_estimate=cost,
        )(x2d, self.Wk)


# Functional entry point: basis/kron construction cached per (L, dtype).
@functools.lru_cache(maxsize=None)
def _get_dst_module(dst_length: int, dtype_name: str) -> DiscreteSineTransform:
    return DiscreteSineTransform(dst_length, dtype=jnp.dtype(dtype_name))


def discrete_sine_transform(x: jnp.ndarray) -> jnp.ndarray:
    """Apply DST along the last axis (basis built from x.shape[-1])."""
    return _get_dst_module(int(x.shape[-1]), jnp.dtype(x.dtype).name)(x)


# --------------------------------------------------------------------------- #
def _ref(x, W):
    return np.matmul(np.asarray(x, np.float64), np.asarray(W, np.float64))


if __name__ == "__main__":
    key = jax.random.PRNGKey(0)

    # 1) Main example: batch=2, channels=4, seq=16, dst_length=16 (lane-packed).
    dst16 = DiscreteSineTransform(16)
    x = jax.random.normal(key, (2, 4, 16, 16), dtype=jnp.float32)
    y = dst16(x)
    jax.block_until_ready(y)
    np.testing.assert_allclose(np.asarray(y), _ref(x, dst16.W), rtol=1e-4, atol=1e-4)

    # 2) Multi-tile pipelined path (>=2 grid steps): 512 rows -> 64 packed rows.
    x2 = jax.random.normal(jax.random.PRNGKey(0), (2, 4, 64, 16), jnp.float32)
    y2 = dst16(x2)
    jax.block_until_ready(y2)
    np.testing.assert_allclose(np.asarray(y2), _ref(x2, dst16.W), rtol=1e-4, atol=1e-4)

    # 3) Row remainder: M=15 not a multiple of g=8 -> zero-pad rows, slice back.
    x3 = jax.random.normal(jax.random.PRNGKey(0), (5, 3, 16), jnp.float32)
    y3 = dst16(x3)
    jax.block_until_ready(y3)
    np.testing.assert_allclose(np.asarray(y3), _ref(x3, dst16.W), rtol=1e-4, atol=1e-4)

    # 4) Column-padded lane-dense path: L=40 (lcm(40,128)=640 > 512 -> pad to 128).
    dst40 = DiscreteSineTransform(40)
    x4 = jax.random.normal(jax.random.PRNGKey(0), (2, 4, 16, 40), jnp.float32)
    y4 = dst40(x4)
    jax.block_until_ready(y4)
    np.testing.assert_allclose(np.asarray(y4), _ref(x4, dst40.W), rtol=1e-4, atol=1e-4)

    # 5) Large-L tiled path (K/N tiling + f32 accumulator): L=640.
    dst640 = DiscreteSineTransform(640)
    x5 = jax.random.normal(jax.random.PRNGKey(0), (2, 3, 640), jnp.float32)
    y5 = dst640(x5)
    jax.block_until_ready(y5)
    np.testing.assert_allclose(np.asarray(y5), _ref(x5, dst640.W), rtol=1e-4, atol=1e-4)

    # 6) Documented diffsptk example: dst(ramp(3)) with L=4.
    y6 = discrete_sine_transform(jnp.arange(4, dtype=jnp.float32))
    jax.block_until_ready(y6)
    np.testing.assert_allclose(
        np.asarray(y6),
        np.array([2.7716, -2.0, 1.1481, -1.0], dtype=np.float32),
        rtol=1e-3, atol=1e-3,
    )

    print("KERNEL_OK")
</pallas_src>

<mosaic_0001>
module attributes {stable_mosaic.version = 11 : i64} {
  func.func @_dst_resident_kernel(%arg0: i32, %arg1: memref<16x128xf32, #tpu.memory_space<vmem>>, %arg2: memref<128x128xf32, #tpu.memory_space<vmem>>, %arg3: memref<16x128xf32, #tpu.memory_space<vmem>>) attributes {dimension_semantics = [#tpu.dimension_semantics<parallel>], iteration_bounds = array<i64: 1>, scalar_prefetch = 0 : i64, scratch_operands = 0 : i64, tpu.core_type = #tpu.core_type<tc>, window_params = [{transform_indices = @transform_0, window_bounds = array<i64: 16, 128>}, {pipeline_mode = #tpu.pipeline_mode<synchronous>, transform_indices = @transform_1, window_bounds = array<i64: 128, 128>}, {transform_indices = @transform_2, window_bounds = array<i64: 16, 128>}]} {
    %c0 = arith.constant 0 : index
    %c0_0 = arith.constant 0 : index
    %0 = vector.load %arg1[%c0, %c0_0] : memref<16x128xf32, #tpu.memory_space<vmem>>, vector<16x128xf32>
    %c0_1 = arith.constant 0 : index
    %c0_2 = arith.constant 0 : index
    %1 = vector.load %arg2[%c0_1, %c0_2] : memref<128x128xf32, #tpu.memory_space<vmem>>, vector<128x128xf32>
    %cst = arith.constant dense<0.000000e+00> : vector<16x128xf32>
    %2 = tpu.matmul %0, %1, %cst {dimension_numbers = #tpu.dot_dimension_numbers<[1], [0], [0], [1], [0, 0, 1, 1], [], []>} : vector<16x128xf32>, vector<128x128xf32>, vector<16x128xf32> -> vector<16x128xf32>
    %c0_3 = arith.constant 0 : index
    %c0_4 = arith.constant 0 : index
    %3 = vector.load %arg3[%c0_3, %c0_4] : memref<16x128xf32, #tpu.memory_space<vmem>>, vector<16x128xf32>
    tpu.vector_store %arg3[%c0_3, %c0_4], %2 {strides = array<i32>} : memref<16x128xf32, #tpu.memory_space<vmem>>, vector<16x128xf32>,
    return
  }
  func.func @transform_0(%arg0: i32) -> (i32, i32) {
    %c0_i32 = arith.constant 0 : i32
    %c0_i32_0 = arith.constant 0 : i32
    return %arg0, %c0_i32 : i32, i32
  }
  func.func @transform_1(%arg0: i32) -> (i32, i32) {
    %c0_i32 = arith.constant 0 : i32
    %c0_i32_0 = arith.constant 0 : i32
    %c0_i32_1 = arith.constant 0 : i32
    return %c0_i32, %c0_i32_0 : i32, i32
  }
  func.func @transform_2(%arg0: i32) -> (i32, i32) {
    %c0_i32 = arith.constant 0 : i32
    %c0_i32_0 = arith.constant 0 : i32
    return %arg0, %c0_i32 : i32, i32
  }
}

</mosaic_0001>

<bundles_post_ra>
// kernel: tpu_custom_call.1
= control target key start
LH: loop header
LB: loop body
LE: loop exit
PB: predicated region body
PF: predicated region fallthrough
CT: control target
= control target key end

     0   :  { %7 = vsyncpa [#allocation3], 0  ;;  %s380_s0 = inlined_call_operand.hbm [shape: f32[16,128], index: 0, kind: input, shape index: {}]   ;;  %s381_s1 = inlined_call_operand.hbm [shape: f32[128,128], index: 1, kind: input, shape index: {}]   ;;  %s382_s2 = inlined_call_operand.hbm [shape: f32[16,128], index: 2, kind: output, shape index: {}]  }
   0x1   :  { %8 = vsyncpa [#allocation6], 0 }
   0x2   :  { %9 = vsyncpa [#allocation4], 0  ;;  %s315_s9 = smov [#allocation2]   ;;  %s243_s13 = scalar_lea.hbm %s380_s0, 256 }
   0x3   :  { %s15_s10 = sshll.u32 %s315_s9, 4  ;;  %p244_p0 = scmp.ne.s32.totalorder %s380_s0, %s243_s13  ;;  %s16_s10 = int_to_ptr.vmem [resolvable:$true] %s15_s10 }
   0x4   :  { %p247_p1 = scmp.lt.u32.totalorder %s243_s13, %s380_s0 }
   0x6   :  { %p249_p2 = pnand %p247_p1, %p244_p0 }
   0x8   :  { %252 = shalt.err (!%p249_p2)
}
   0x9   :  { %s253_s18 = scalar_lea.vmem %s16_s10, 256  ;;  %p258_p4 = scmp.lt.s32.totalorder %s16_s10, %s16_s10 }
   0xa   :  { %p254_p3 = scmp.ne.s32.totalorder %s16_s10, %s253_s18  ;;  %p259_p5 = scmp.lt.s32.totalorder %s253_s18, %s253_s18 }
   0xc   :  { %p260_p6 = por %p259_p5, %p258_p4 }
   0xe   :  { %p261_p7 = pnand %p260_p6, %p254_p3 }
  0x10   :  { %264 = shalt.err (!%p261_p7)
}
  0x11   :  { %s316_s19 = smov 128   ;;  %s317_s20 = smov 8  }
  0x12   :  { %21 = dma.hbm_to_vmem [thread:$0]  %s380_s0, 256, %s16_s10, [#allocation3], %s316_s19, %s316_s19, %s317_s20  }
  0x13   :  { %s318_s23 = smov [#allocation5]   ;;  %s265_s27 = scalar_lea.hbm %s381_s1, 2048 }
  0x14   :  { %s27_s24 = sshll.u32 %s318_s23, 4  ;;  %p266_p8 = scmp.ne.s32.totalorder %s381_s1, %s265_s27  ;;  %s28_s24 = int_to_ptr.vmem [resolvable:$true] %s27_s24 }
  0x15   :  { %p269_p9 = scmp.lt.u32.totalorder %s265_s27, %s381_s1 }
  0x17   :  { %p271_p10 = pnand %p269_p9, %p266_p8 }
  0x19   :  { %274 = shalt.err (!%p271_p10)
}
  0x1a   :  { %s275_s4 = scalar_lea.vmem %s28_s24, 2048  ;;  %p280_p12 = scmp.lt.s32.totalorder %s28_s24, %s28_s24 }
  0x1b   :  { %p276_p11 = scmp.ne.s32.totalorder %s28_s24, %s275_s4  ;;  %p281_p13 = scmp.lt.s32.totalorder %s275_s4, %s275_s4 }
  0x1d   :  { %p282_p0 = por %p281_p13, %p280_p12 }
  0x1f   :  { %p283_p1 = pnand %p282_p0, %p276_p11 }
  0x21   :  { %286 = shalt.err (!%p283_p1)
}
  0x22   :  { %33 = dma.hbm_to_vmem [thread:$0]  %s381_s1, 2048, %s28_s24, [#allocation6], %s316_s19, %s316_s19, %s317_s20  }
  0x23   :  { %309 = dma.done.wait [#allocation3], 256  }
  0x24   :  { %310 = vsyncadd [#allocation3], 4294967040 }
  0x25   :  { %311 = dma.done.wait [#allocation6], 2048  }
  0x26   :  { %312 = vsyncadd [#allocation6], 4294965248  ;;  %v42_v0 = vld [vmem:[#allocation5] sm:$0xff]  ;;  %v43_v1 = vld [vmem:[#allocation5 + $0x8] sm:$0xff]  ;;  %s319_s1 = smov [#allocation7]  }
  0x27   :  { %v44_v2 = vld [vmem:[#allocation5 + $0x10] sm:$0xff]  ;;  %v206_v3 = vpack.c.bf16 %v43_v1, %v42_v0  ;;  %v45_v4 = vld [vmem:[#allocation5 + $0x18] sm:$0xff]  ;;  %v46_v6 = vld [vmem:[#allocation5 + $0x20] sm:$0xff]  ;;  %s140_s6 = sshll.u32 %s319_s1, 4  ;;  %s141_s6 = int_to_ptr.vmem [resolvable:$true] %s140_s6 }
  0x28   :  { %v210_v5 = vpack.c.bf16 %v45_v4, %v44_v2  ;;  %v47_v7 = vld [vmem:[#allocation5 + $0x28] sm:$0xff]  ;;  %v40_v9 = vld [vmem:[#allocation2] sm:$0xff]  ;;  %v49_v11 = vld [vmem:[#allocation5 + $0x38] sm:$0xff]  ;;  %s287_s7 = scalar_lea.vmem %s141_s6, 256  ;;  %p292_p3 = scmp.lt.s32.totalorder %s141_s6, %s141_s6 }
  0x29   :  { %207 = vmatprep.subr.bf16.mxu0 %v206_v3  ;;  %v214_v8 = vpack.c.bf16 %v47_v7, %v46_v6  ;;  %v48_v10 = vld [vmem:[#allocation5 + $0x30] sm:$0xff]  ;;  %203 = vmatprep.mubr.f32.mxu0 %v40_v9  ;;  %v50_v13 = vld [vmem:[#allocation5 + $0x40] sm:$0xff]  ;;  %v51_v14 = vld [vmem:[#allocation5 + $0x48] sm:$0xff]  ;;  %p288_p2 = scmp.ne.s32.totalorder %s141_s6, %s287_s7  ;;  %p293_p4 = scmp.lt.s32.totalorder %s287_s7, %s287_s7 }
  0x2a   :  { %209 = vmatpush3.bf16.msra.mxu0 %v206_v3  ;;  %v218_v12 = vpack.c.bf16 %v49_v11, %v48_v10  ;;  %v222_v15 = vpack.c.bf16 %v51_v14, %v50_v13  ;;  %v52_v16 = vld [vmem:[#allocation5 + $0x50] sm:$0xff]  ;;  %v53_v17 = vld [vmem:[#allocation5 + $0x58] sm:$0xff]  ;;  %v54_v19 = vld [vmem:[#allocation5 + $0x60] sm:$0xff] }
  0x2b   :  { %211 = vmatprep.subr.bf16.mxu0 %v210_v5  ;;  %v226_v18 = vpack.c.bf16 %v53_v17, %v52_v16  ;;  %v55_v20 = vld [vmem:[#allocation5 + $0x68] sm:$0xff]  ;;  %v56_v22 = vld [vmem:[#allocation5 + $0x70] sm:$0xff]  ;;  %v57_v23 = vld [vmem:[#allocation5 + $0x78] sm:$0xff]  ;;  %p294_p5 = por %p293_p4, %p292_p3 }
  0x2c   :  { %v230_v21 = vpack.c.bf16 %v55_v20, %v54_v19  ;;  %v234_v24 = vpack.c.bf16 %v57_v23, %v56_v22  ;;  %v41_v25 = vld [vmem:[#allocation2 + $0x8] sm:$0xff] }
  0x2d   :  { %p295_p6 = pnand %p294_p5, %p288_p2 }
  0x2e   :  { %213 = vmatpush3.bf16.msra.mxu0 %v210_v5 }
  0x2f   :  { %215 = vmatprep.subr.bf16.mxu0 %v214_v8 }
  0x32   :  { %217 = vmatpush3.bf16.msra.mxu0 %v214_v8 }
  0x33   :  { %219 = vmatprep.subr.bf16.mxu0 %v218_v12 }
  0x36   :  { %221 = vmatpush3.bf16.msra.mxu0 %v218_v12 }
  0x37   :  { %223 = vmatprep.subr.bf16.mxu0 %v222_v15 }
  0x3a   :  { %225 = vmatpush3.bf16.msra.mxu0 %v222_v15 }
  0x3b   :  { %227 = vmatprep.subr.bf16.mxu0 %v226_v18 }
  0x3e   :  { %229 = vmatpush3.bf16.msra.mxu0 %v226_v18 }
  0x3f   :  { %231 = vmatprep.subr.bf16.mxu0 %v230_v21 }
  0x42   :  { %233 = vmatpush3.bf16.msra.mxu0 %v230_v21 }
  0x43   :  { %235 = vmatprep.subr.bf16.mxu0 %v234_v24 }
  0x46   :  { %237 = vmatpush3.bf16.msra.mxu0 %v234_v24 }
  0x49   :  { %204 = vmatmul.mubr.f32.vlgmr.msra.gmra.mrb[0].mxu0 %v41_v25 }
 0x11c   :  { %v205_v26 = vpop.f32.mrb[0].mxu0 }
 0x11d   :  { %134 = vst [vmem:[#allocation7 + $0x8] sm:$0xff] %v205_v26  ;;  %v124_v27 = vpop.f32.mrb[1].mxu0 }
 0x11e   :  { %133 = vst [vmem:[#allocation7] sm:$0xff] %v124_v27 }
 0x11f   :  { %298 = shalt.err (!%p295_p6)
}
 0x120   :  { %s299_s10 = scalar_lea.hbm %s382_s2, 256 }
 0x121   :  { %p300_p7 = scmp.ne.s32.totalorder %s382_s2, %s299_s10  ;;  %p303_p8 = scmp.lt.u32.totalorder %s299_s10, %s382_s2 }
 0x123   :  { %p305_p9 = pnand %p303_p8, %p300_p7 }
 0x125   :  { %308 = shalt.err (!%p305_p9)
}
 0x126   :  { %146 = dma.vmem_to_hbm [thread:$0]  %s141_s6, 256, %s382_s2, [#allocation4], %s316_s19, %s316_s19, %s317_s20  }
 0x127   :  { %313 = dma.done.wait [#allocation4], 256  }
 0x128   :  { %314 = vsyncadd [#allocation4], 4294967040 }
 0x129   :  { %150 = vsyncpa [#allocation3], 1 }
 0x12a   :  { %151 = vsyncpa [#allocation6], 1 }
 0x12b   :  { %152 = vsyncpa [#allocation4], 1 }

</bundles_post_ra>
